<compile_context>
chip_gen: v7x
topology: tpu7x:2x2x1
jax: 0.10.0
libtpu: 0.0.40
codegen_flags: <defaults>
</compile_context>

<pallas_src>
import jax
import jax.numpy as jnp
from jax import lax
from jax.experimental import pallas as pl
from jax.experimental.pallas import tpu as pltpu

EPS = 1e-5


# --------------------------------------------------------------------------
# Budget / tiling helpers
# --------------------------------------------------------------------------
def _vmem_budget_bytes():
    """Per-generation scoped-VMEM request (not a flat lowest-common 32 MiB)."""
    cap = None
    try:
        info = pltpu.get_tpu_info()
        cap = getattr(info, "vmem_capacity_bytes", None)
    except Exception:
        cap = None
    if not cap:
        cap = 64 * 1024 * 1024  # conservative default (v7x physical per-TC)
    budget = int(cap * 0.7)     # 128 MiB -> ~89 MiB (v5e/v6e); 64 MiB -> ~44 MiB (v7x)
    return max(32 * 1024 * 1024, min(budget, 100 * 1024 * 1024))


def _sublane_mult(itemsize):
    # Sub-32-bit dtypes pack along sublanes: the second-to-last block dim
    # should be a multiple of 8 (f32), 16 (bf16), or 32 (int8/fp8).
    return {4: 8, 2: 16, 1: 32}.get(itemsize, 8)


def _channel_tile_candidates(C, sub):
    """Descending list of legal channel tiles (sublane-dense or full extent)."""
    if C % sub == 0:
        cands = {t for t in (256, 128, 64, 32, 16, 8)
                 if t % sub == 0 and t <= C and C % t == 0}
        cands.add(C)
        return sorted(cands, reverse=True)
    return [C]  # full-extent channel block is always legal


def _pick_tiles_two_pass(N, C, M, itemsize, budget, c_cands, max_tile_bytes=None):
    """Byte-budget-aware (N, tc, tm) tile for the two-pass fallback."""
    comp = max(itemsize, 4)  # intermediates are f32
    if max_tile_bytes is None:
        # ~2 in + 2 out double-buffered tiles + f32 temporaries live at once.
        # 1-4 MiB tiles already reach ~85% of HBM roofline; larger buys nothing.
        max_tile_bytes = min(max(budget // 12, 1 << 20), 4 << 20)
    m_cands = [t for t in (4096, 2048, 1024, 512, 256, 128) if t <= M and M % t == 0]
    if not m_cands:
        m_cands = [M]  # full-extent spatial block (legal even if not 128-aligned)
    best = None
    for tc in c_cands:
        for tm in m_cands:
            if N * tc * tm * comp <= max_tile_bytes:
                key = (tm, tc)  # prefer lane-dense (large tm), then large tc
                if best is None or key > best[0]:
                    best = (key, tc, tm)
    if best is None:
        return c_cands[-1], m_cands[-1]  # smallest legal tiles
    return best[1], best[2]


# --------------------------------------------------------------------------
# Kernels
# --------------------------------------------------------------------------
def _make_fused_kernel(count):
    """Single-pass BN+ReLU: whole (N, tc, M) slab resident in VMEM."""
    inv_count = 1.0 / float(count)

    def kernel(x_ref, g_ref, b_ref, o_ref):
        # x_ref/o_ref: (N, tc, M); g_ref/b_ref: (tc, 1) f32.
        x = x_ref[...].astype(jnp.float32)
        s0 = jnp.sum(x, axis=0)                                   # (tc, M)
        mean = jnp.sum(s0, axis=1, keepdims=True) * inv_count     # (tc, 1)
        centered = x - mean[None, :, :]
        c0 = jnp.sum(centered * centered, axis=0)                 # (tc, M)
        var = jnp.sum(c0, axis=1, keepdims=True) * inv_count      # biased var, no cancellation
        inv_std = lax.rsqrt(var + EPS)                            # EUP slot (free)
        a = g_ref[...] * inv_std                                  # (tc, 1)
        y = centered * a[None, :, :] + b_ref[...][None, :, :]
        o_ref[...] = jnp.maximum(y, 0.0).astype(o_ref.dtype)

    return kernel


def _stats_kernel(x_ref, sum_ref, sq_ref):
    # x_ref: (N, tc, tm); sum_ref/sq_ref: (1, tc, 1) PARTIAL sums, written once
    # per (ci, mi) block -> both grid axes are 'parallel' (megacore-friendly
    # even when there is only one channel block).
    x = x_ref[...].astype(jnp.float32)
    s0 = jnp.sum(x, axis=0)          # (tc, tm)
    q0 = jnp.sum(x * x, axis=0)      # (tc, tm)
    sum_ref[...] = jnp.sum(s0, axis=1, keepdims=True)[None, :, :]
    sq_ref[...] = jnp.sum(q0, axis=1, keepdims=True)[None, :, :]


def _make_norm_kernel(count):
    """Scale/bias + ReLU with the per-channel epilogue folded in-kernel."""
    inv_count = 1.0 / float(count)

    def kernel(x_ref, sum_ref, sq_ref, g_ref, b_ref, o_ref):
        # x_ref/o_ref: (N, tc, tm); sum/sq/g/b: (tc, 1) f32.  The tiny (tc,1)
        # epilogue is recomputed per tile (rides otherwise-idle EUP/VPU slots).
        x = x_ref[...].astype(jnp.float32)
        mean = sum_ref[...] * inv_count
        var = jnp.maximum(sq_ref[...] * inv_count - mean * mean, 0.0)
        inv_std = lax.rsqrt(var + EPS)
        a = g_ref[...] * inv_std
        b = b_ref[...] - mean * a
        y = x * a[None, :, :] + b[None, :, :]
        o_ref[...] = jnp.maximum(y, 0.0).astype(o_ref.dtype)

    return kernel


# --------------------------------------------------------------------------
# Wrapper
# --------------------------------------------------------------------------
def bn_relu(x_nchw, gamma, beta, *, donate_input=False,
            force_two_pass=False, max_tile_bytes=None):
    """BatchNorm2d (train-mode batch stats, affine, eps=1e-5) + ReLU.

    x_nchw: (N, C, H, W); gamma, beta: (C,).
    donate_input: alias the output onto x (only if the caller no longer needs x).
    force_two_pass / max_tile_bytes: testing hooks for the fallback path.
    """
    N, C, H, W = x_nchw.shape
    M = H * W
    x3 = x_nchw.reshape(N, C, M)  # free, layout-preserving (no transpose)
    itemsize = jnp.dtype(x_nchw.dtype).itemsize
    budget = _vmem_budget_bytes()
    sub = _sublane_mult(itemsize)
    c_cands = _channel_tile_candidates(C, sub)
    count = N * M
    g2 = gamma.reshape(C, 1).astype(jnp.float32)
    b2 = beta.reshape(C, 1).astype(jnp.float32)
    alias = {0: 0} if donate_input else {}

    # ---- Fused single-pass path (1 read + 1 write of x) --------------------
    fused_tc = None
    if not force_two_pass:
        fits = []
        for t in c_cands:
            s = N * t * M
            # double-buffered in + out slabs + ~3 f32 temporaries live at once
            need = 2 * s * itemsize + 2 * s * itemsize + 3 * s * 4
            if need <= budget:
                fits.append(t)
        if fits:
            # Prefer >= 2 channel blocks so the single 'parallel' axis still
            # shards across both v7x TensorCores.
            multi = [t for t in fits if C // t >= 2]
            fused_tc = max(multi) if multi else max(fits)

    if fused_tc is not None:
        tc = fused_tc
        x_spec = pl.BlockSpec((N, tc, M), lambda ci: (0, ci, 0))
        v_spec = pl.BlockSpec((tc, 1), lambda ci: (ci, 0))
        out3 = pl.pallas_call(
            _make_fused_kernel(count),
            out_shape=jax.ShapeDtypeStruct((N, C, M), x_nchw.dtype),
            grid_spec=pltpu.PrefetchScalarGridSpec(
                num_scalar_prefetch=0,
                grid=(C // tc,),
                in_specs=[x_spec, v_spec, v_spec],
                out_specs=x_spec,
            ),
            compiler_params=pltpu.CompilerParams(
                dimension_semantics=("parallel",),
                vmem_limit_bytes=budget,
            ),
            input_output_aliases=alias,
        )(x3, g2, b2)
        return out3.reshape(N, C, H, W)

    # ---- Two-pass fallback (2 reads + 1 write of x) -------------------------
    tc, tm = _pick_tiles_two_pass(N, C, M, itemsize, budget, c_cands, max_tile_bytes)
    grid = (C // tc, M // tm)
    x_spec = pl.BlockSpec((N, tc, tm), lambda ci, mi: (0, ci, mi))
    v_spec = pl.BlockSpec((tc, 1), lambda ci, mi: (ci, 0))
    part_spec = pl.BlockSpec((1, tc, 1), lambda ci, mi: (mi, ci, 0))

    # Pass 1: per-(channel block, spatial block) partial sums. Both axes
    # 'parallel' (each output block is written exactly once).
    sum_p, sq_p = pl.pallas_call(
        _stats_kernel,
        out_shape=(jax.ShapeDtypeStruct((grid[1], C, 1), jnp.float32),
                   jax.ShapeDtypeStruct((grid[1], C, 1), jnp.float32)),
        grid_spec=pltpu.PrefetchScalarGridSpec(
            num_scalar_prefetch=0,
            grid=grid,
            in_specs=[x_spec],
            out_specs=[part_spec, part_spec],
        ),
        compiler_params=pltpu.CompilerParams(
            dimension_semantics=("parallel", "parallel"),
            vmem_limit_bytes=budget,
        ),
    )(x3)

    # Tiny reduction over spatial blocks -> (C, 1).
    sum_c = jnp.sum(sum_p, axis=0)
    sq_c = jnp.sum(sq_p, axis=0)

    # Pass 2: fused per-channel epilogue + scale/bias + ReLU.
    out3 = pl.pallas_call(
        _make_norm_kernel(count),
        out_shape=jax.ShapeDtypeStruct((N, C, M), x_nchw.dtype),
        grid_spec=pltpu.PrefetchScalarGridSpec(
            num_scalar_prefetch=0,
            grid=grid,
            in_specs=[x_spec, v_spec, v_spec, v_spec, v_spec],
            out_specs=x_spec,
        ),
        compiler_params=pltpu.CompilerParams(
            dimension_semantics=("parallel", "parallel"),
            vmem_limit_bytes=budget,
        ),
        input_output_aliases=alias,
    )(x3, sum_c, sq_c, g2, b2)
    return out3.reshape(N, C, H, W)


# --------------------------------------------------------------------------
# Reference + test
# --------------------------------------------------------------------------
def _reference(x_nchw, gamma, beta):
    mean = jnp.mean(x_nchw, axis=(0, 2, 3), keepdims=True)
    var = jnp.mean((x_nchw - mean) ** 2, axis=(0, 2, 3), keepdims=True)
    y = (x_nchw - mean) / jnp.sqrt(var + EPS)
    y = y * gamma.reshape(1, -1, 1, 1) + beta.reshape(1, -1, 1, 1)
    return jnp.maximum(y, 0.0)


if __name__ == "__main__":
    key = jax.random.PRNGKey(0)
    kx, kg, kb, kx2, kg2, kb2 = jax.random.split(key, 6)

    # Primary shape (small, consistent with a BnRelu stage of Hourglass2D_down).
    # Exercises the fused single-pass path with a full-C channel block.
    N, C, H, W = 2, 4, 16, 16
    x = jax.random.normal(kx, (N, C, H, W), dtype=jnp.float32)
    gamma = 1.0 + 0.1 * jax.random.normal(kg, (C,), dtype=jnp.float32)
    beta = 0.1 * jax.random.normal(kb, (C,), dtype=jnp.float32)

    out = bn_relu(x, gamma, beta)
    jax.block_until_ready(out)
    ref = _reference(x, gamma, beta)
    assert out.shape == ref.shape
    assert jnp.allclose(out, ref, atol=1e-4, rtol=1e-4)

    # Secondary shape: fused path with 2 channel blocks (tc=8, megacore-friendly).
    N2, C2, H2, W2 = 1, 16, 16, 16
    x2 = jax.random.normal(kx2, (N2, C2, H2, W2), dtype=jnp.float32)
    gamma2 = 1.0 + 0.1 * jax.random.normal(kg2, (C2,), dtype=jnp.float32)
    beta2 = 0.1 * jax.random.normal(kb2, (C2,), dtype=jnp.float32)
    out2 = bn_relu(x2, gamma2, beta2)
    jax.block_until_ready(out2)
    ref2 = _reference(x2, gamma2, beta2)
    assert jnp.allclose(out2, ref2, atol=1e-4, rtol=1e-4)

    # Same shape, forced two-pass fallback with small tiles -> exercises the
    # multi-block (2 x 2) grid, partial-sum stats pass, and folded epilogue.
    out3 = bn_relu(x2, gamma2, beta2, force_two_pass=True,
                   max_tile_bytes=8 * 128 * 4)
    jax.block_until_ready(out3)
    assert jnp.allclose(out3, ref2, atol=1e-4, rtol=1e-4)

    print("KERNEL_OK")
</pallas_src>

<mosaic_0001>
module attributes {stable_mosaic.version = 11 : i64} {
  func.func @kernel(%arg0: i32, %arg1: memref<2x4x256xf32, #tpu.memory_space<vmem>>, %arg2: memref<4x1xf32, #tpu.memory_space<vmem>>, %arg3: memref<4x1xf32, #tpu.memory_space<vmem>>, %arg4: memref<2x4x256xf32, #tpu.memory_space<vmem>>) attributes {dimension_semantics = [#tpu.dimension_semantics<parallel>], iteration_bounds = array<i64: 1>, scalar_prefetch = 0 : i64, scratch_operands = 0 : i64, tpu.core_type = #tpu.core_type<tc>, window_params = [{transform_indices = @transform_0, window_bounds = array<i64: 2, 4, 256>}, {transform_indices = @transform_1, window_bounds = array<i64: 4, 1>}, {transform_indices = @transform_2, window_bounds = array<i64: 4, 1>}, {transform_indices = @transform_3, window_bounds = array<i64: 2, 4, 256>}]} {
    %c0 = arith.constant 0 : index
    %c0_0 = arith.constant 0 : index
    %c0_1 = arith.constant 0 : index
    %0 = vector.load %arg1[%c0, %c0_0, %c0_1] : memref<2x4x256xf32, #tpu.memory_space<vmem>>, vector<2x4x256xf32>
    %cst = arith.constant dense<0.000000e+00> : vector<4x256xf32>
    %1 = vector.multi_reduction <add>, %0, %cst [0] : vector<2x4x256xf32> to vector<4x256xf32>
    %cst_2 = arith.constant dense<0.000000e+00> : vector<4xf32>
    %2 = vector.multi_reduction <add>, %1, %cst_2 [1] : vector<4x256xf32> to vector<4xf32>
    %3 = vector.shape_cast %2 : vector<4xf32> to vector<4x1xf32>
    %cst_3 = arith.constant 0.001953125 : f32
    %4 = vector.broadcast %cst_3 : f32 to vector<4x1xf32>
    %5 = arith.mulf %3, %4 : vector<4x1xf32>
    %6 = vector.shape_cast %5 : vector<4x1xf32> to vector<1x4x1xf32>
    %7 = vector.broadcast %6 : vector<1x4x1xf32> to vector<2x4x256xf32>
    %8 = arith.subf %0, %7 : vector<2x4x256xf32>
    %9 = arith.mulf %8, %8 : vector<2x4x256xf32>
    %cst_4 = arith.constant dense<0.000000e+00> : vector<4x256xf32>
    %10 = vector.multi_reduction <add>, %9, %cst_4 [0] : vector<2x4x256xf32> to vector<4x256xf32>
    %cst_5 = arith.constant dense<0.000000e+00> : vector<4xf32>
    %11 = vector.multi_reduction <add>, %10, %cst_5 [1] : vector<4x256xf32> to vector<4xf32>
    %12 = vector.shape_cast %11 : vector<4xf32> to vector<4x1xf32>
    %cst_6 = arith.constant 0.001953125 : f32
    %13 = vector.broadcast %cst_6 : f32 to vector<4x1xf32>
    %14 = arith.mulf %12, %13 : vector<4x1xf32>
    %cst_7 = arith.constant 9.99999974E-6 : f32
    %15 = vector.broadcast %cst_7 : f32 to vector<4x1xf32>
    %16 = arith.addf %14, %15 : vector<4x1xf32>
    %17 = math.rsqrt %16 : vector<4x1xf32>
    %c0_8 = arith.constant 0 : index
    %c0_9 = arith.constant 0 : index
    %18 = vector.load %arg2[%c0_8, %c0_9] : memref<4x1xf32, #tpu.memory_space<vmem>>, vector<4x1xf32>
    %19 = arith.mulf %18, %17 : vector<4x1xf32>
    %20 = vector.shape_cast %19 : vector<4x1xf32> to vector<1x4x1xf32>
    %21 = vector.broadcast %20 : vector<1x4x1xf32> to vector<2x4x256xf32>
    %22 = arith.mulf %8, %21 : vector<2x4x256xf32>
    %c0_10 = arith.constant 0 : index
    %c0_11 = arith.constant 0 : index
    %23 = vector.load %arg3[%c0_10, %c0_11] : memref<4x1xf32, #tpu.memory_space<vmem>>, vector<4x1xf32>
    %24 = vector.shape_cast %23 : vector<4x1xf32> to vector<1x4x1xf32>
    %25 = vector.broadcast %24 : vector<1x4x1xf32> to vector<2x4x256xf32>
    %26 = arith.addf %22, %25 : vector<2x4x256xf32>
    %cst_12 = arith.constant 0.000000e+00 : f32
    %27 = vector.broadcast %cst_12 : f32 to vector<2x4x256xf32>
    %28 = arith.maximumf %26, %27 : vector<2x4x256xf32>
    %c0_13 = arith.constant 0 : index
    %c0_14 = arith.constant 0 : index
    %c0_15 = arith.constant 0 : index
    %29 = vector.load %arg4[%c0_13, %c0_14, %c0_15] : memref<2x4x256xf32, #tpu.memory_space<vmem>>, vector<2x4x256xf32>
    tpu.vector_store %arg4[%c0_13, %c0_14, %c0_15], %28 {strides = array<i32>} : memref<2x4x256xf32, #tpu.memory_space<vmem>>, vector<2x4x256xf32>,
    return
  }
  func.func @transform_0(%arg0: i32) -> (i32, i32, i32) {
    %c0_i32 = arith.constant 0 : i32
    %c0_i32_0 = arith.constant 0 : i32
    %c0_i32_1 = arith.constant 0 : i32
    return %c0_i32, %arg0, %c0_i32_0 : i32, i32, i32
  }
  func.func @transform_1(%arg0: i32) -> (i32, i32) {
    %c0_i32 = arith.constant 0 : i32
    %c0_i32_0 = arith.constant 0 : i32
    return %arg0, %c0_i32 : i32, i32
  }
  func.func @transform_2(%arg0: i32) -> (i32, i32) {
    %c0_i32 = arith.constant 0 : i32
    %c0_i32_0 = arith.constant 0 : i32
    return %arg0, %c0_i32 : i32, i32
  }
  func.func @transform_3(%arg0: i32) -> (i32, i32, i32) {
    %c0_i32 = arith.constant 0 : i32
    %c0_i32_0 = arith.constant 0 : i32
    %c0_i32_1 = arith.constant 0 : i32
    return %c0_i32, %arg0, %c0_i32_0 : i32, i32, i32
  }
}

</mosaic_0001>

<bundles_post_ra>
// kernel: tpu_custom_call.1
= control target key start
LH: loop header
LB: loop body
LE: loop exit
PB: predicated region body
PF: predicated region fallthrough
CT: control target
= control target key end

     0   :  { %8 = vsyncpa [#allocation3], 0  ;;  %s269_s0 = inlined_call_operand.hbm [shape: f32[2,4,256], index: 0, kind: input, shape index: {}]   ;;  %s270_s1 = inlined_call_operand.vmem [shape: f32[4,1], index: 1, kind: input, shape index: {}]   ;;  %s271_s2 = inlined_call_operand.vmem [shape: f32[4,1], index: 2, kind: input, shape index: {}]   ;;  %s272_s3 = inlined_call_operand.hbm [shape: f32[2,4,256], index: 3, kind: output, shape index: {}]  }
   0x1   :  { %9 = vsyncpa [#allocation4], 0  ;;  %s195_s12 = smov [#allocation2]   ;;  %s147_s16 = scalar_lea.hbm %s269_s0, 256 }
   0x2   :  { %s15_s13 = sshll.u32 %s195_s12, 4  ;;  %p148_p0 = scmp.ne.s32.totalorder %s269_s0, %s147_s16  ;;  %s16_s13 = int_to_ptr.vmem [resolvable:$true] %s15_s13 }
   0x3   :  { %p151_p1 = scmp.lt.u32.totalorder %s147_s16, %s269_s0 }
   0x5   :  { %p153_p2 = pnand %p151_p1, %p148_p0 }
   0x7   :  { %156 = shalt.err (!%p153_p2)
}
   0x8   :  { %s157_s21 = scalar_lea.vmem %s16_s13, 256  ;;  %p162_p4 = scmp.lt.s32.totalorder %s16_s13, %s16_s13 }
   0x9   :  { %p158_p3 = scmp.ne.s32.totalorder %s16_s13, %s157_s21  ;;  %p163_p5 = scmp.lt.s32.totalorder %s157_s21, %s157_s21 }
   0xb   :  { %p164_p6 = por %p163_p5, %p162_p4 }
   0xd   :  { %p165_p7 = pnand %p164_p6, %p158_p3 }
   0xf   :  { %168 = shalt.err (!%p165_p7)
}
  0x10   :  { %s196_s22 = smov 128   ;;  %s197_s23 = smov 8  }
  0x11   :  { %21 = dma.hbm_to_vmem [thread:$0]  %s269_s0, 256, %s16_s13, [#allocation3], %s196_s22, %s196_s22, %s197_s23  }
  0x12   :  { %191 = dma.done.wait [#allocation3], 256  }
  0x13   :  { %192 = vsyncadd [#allocation3], 4294967040  ;;  %vm37_vm0 = vcmask 1043456   ;;  %v29_v0 = vld [vmem:[#allocation2] sm:$0xff]  ;;  %v30_v1 = vld [vmem:[#allocation2 + $0x8] sm:$0xff]  ;;  %v54_v15 = vlaneseq  ;;  %v199_v37 = vmov 0  }
  0x14   :  { %v33_v2 = vcombine.high %v29_v0, %v29_v0  ;;  %v34_v3 = vcombine.high %v30_v1, %v30_v1  ;;  %v38_v4 = vsel %vm37_vm0, %v29_v0, 0.0  ;;  %v39_v5 = vsel %vm37_vm0, %v30_v1, 0.0  ;;  %141 = vset.pattern.permute.xlu1 %v199_v37  ;;  %142 = vset.pattern.permute.xlu0 %v199_v37  ;;  %v83_v41 = vld [vmem:[%s270_s1] sm:$0xf]  ;;  %s200_s29 = smov [#allocation5]  }
  0x15   :  { %v40_v6 = vadd.f32 %v39_v5, %v38_v4  ;;  %v198_v13 = vmov 839922192   ;;  %v55_v17 = vshrl.u32 %v54_v15, 7  ;;  %v99_v44 = vld [vmem:[%s271_s2] sm:$0xf]  ;;  %s123_s30 = sshll.u32 %s200_s29, 4  ;;  %s124_s30 = int_to_ptr.vmem [resolvable:$true] %s123_s30 }
  0x16   :  { %v41_v7 = vsel %vm37_vm0, %v33_v2, 0.0  ;;  %v42_v8 = vsel %vm37_vm0, %v34_v3, 0.0  ;;  %v52_v14 = vunpack.c.l.s4 %v198_v13  ;;  %s169_s1 = scalar_lea.vmem %s124_s30, 256  ;;  %p174_p9 = scmp.lt.s32.totalorder %s124_s30, %s124_s30 }
  0x17   :  { %v43_v9 = vadd.f32 %v42_v8, %v41_v7  ;;  %v44_v10 = vsel %vm37_vm0, %v40_v6, 0.0  ;;  %p170_p8 = scmp.ne.s32.totalorder %s124_s30, %s169_s1  ;;  %p175_p10 = scmp.lt.s32.totalorder %s169_s1, %s169_s1 }
  0x18   :  { %v53_v16 = vunpack.c.0.s8 %v52_v14 }
  0x19   :  { %v45_v11 = vsel %vm37_vm0, %v43_v9, 0.0  ;;  %p176_p11 = por %p175_p10, %p174_p9 }
  0x1a   :  { %v46_v12 = vadd.f32 %v45_v11, %v44_v10  ;;  %v56_v18 = vsub.s32 %v53_v16, %v55_v17 }
  0x1b   :  { %p177_p12 = pnand %p176_p11, %p170_p8 }
  0x1c   :  { %47 = vadd.xlane.f32.xlu0 %v46_v12 }
  0xa9   :  { %v48_v19 = vpop.xlane.xlu0 %47 }
  0xaa   :  { %v49_v20 = vmul.f32 0.001953125, %v48_v19 }
  0xac   :  { %v57_v21 = vrot.slane %v49_v20, %v56_v18 }
  0xae   :  { %v59_v22 = vsub.f32 %v29_v0, %v57_v21  ;;  %v60_v23 = vsub.f32 %v30_v1, %v57_v21 }
  0xb0   :  { %v61_v24 = vmul.f32 %v59_v22, %v59_v22  ;;  %v62_v25 = vmul.f32 %v60_v23, %v60_v23 }
  0xb2   :  { %v65_v26 = vcombine.high %v61_v24, %v61_v24  ;;  %v66_v27 = vcombine.high %v62_v25, %v62_v25  ;;  %v69_v28 = vsel %vm37_vm0, %v61_v24, 0.0  ;;  %v70_v29 = vsel %vm37_vm0, %v62_v25, 0.0 }
  0xb3   :  { %v71_v30 = vadd.f32 %v70_v29, %v69_v28 }
  0xb4   :  { %v72_v31 = vsel %vm37_vm0, %v65_v26, 0.0  ;;  %v73_v32 = vsel %vm37_vm0, %v66_v27, 0.0 }
  0xb5   :  { %v74_v33 = vadd.f32 %v73_v32, %v72_v31  ;;  %v75_v34 = vsel %vm37_vm0, %v71_v30, 0.0 }
  0xb7   :  { %v76_v35 = vsel %vm37_vm0, %v74_v33, 0.0 }
  0xb8   :  { %v77_v36 = vadd.f32 %v76_v35, %v75_v34 }
  0xba   :  { %78 = vadd.xlane.f32.xlu0 %v77_v36 }
 0x147   :  { %v79_v38 = vpop.xlane.xlu0 %78 }
 0x148   :  { %v80_v39 = vmul.f32 0.001953125, %v79_v38 }
 0x14a   :  { %v81_v40 = vadd.f32 1e-05, %v80_v39 }
 0x14c   :  { %145 = vrsqrt.f32 %v81_v40 }
 0x156   :  { %v146_v42 = vpop.eup %145 }
 0x157   :  { %v84_v43 = vmul.f32 %v146_v42, %v83_v41 }
 0x159   :  { %87 = vperm.xlu1 %141, %v84_v43  }
 0x15d   :  { %102 = vperm.xlu1 %141, %v99_v44  }
 0x1d8   :  { %v88_v45 = vpop.permute.xlu1 %87 }
 0x1d9   :  { %v95_v46 = vrot.slane %v88_v45, %v56_v18 }
 0x1db   :  { %v97_v48 = vmul.f32 %v95_v46, %v59_v22  ;;  %v98_v49 = vmul.f32 %v95_v46, %v60_v23 }
 0x1dc   :  { %v103_v47 = vpop.permute.xlu1 %102 }
 0x1dd   :  { %v110_v50 = vrot.slane %v103_v47, %v56_v18 }
 0x1df   :  { %v112_v51 = vadd.f32 %v110_v50, %v97_v48  ;;  %v113_v52 = vadd.f32 %v110_v50, %v98_v49 }
 0x1e1   :  { %v114_v53 = vmax.f32 %v112_v51, 0.0  ;;  %v115_v54 = vmax.f32 %v113_v52, 0.0 }
 0x1e3   :  { %116 = vst [vmem:[#allocation5] sm:$0xff] %v114_v53  ;;  %117 = vst [vmem:[#allocation5 + $0x8] sm:$0xff] %v115_v54 }
 0x1e4   :  { %180 = shalt.err (!%p177_p12)
}
 0x1e5   :  { %s181_s5 = scalar_lea.hbm %s272_s3, 256 }
 0x1e6   :  { %p182_p13 = scmp.ne.s32.totalorder %s272_s3, %s181_s5  ;;  %p185_p0 = scmp.lt.u32.totalorder %s181_s5, %s272_s3 }
 0x1e8   :  { %p187_p1 = pnand %p185_p0, %p182_p13 }
 0x1ea   :  { %190 = shalt.err (!%p187_p1)
}
 0x1eb   :  { %129 = dma.vmem_to_hbm [thread:$0]  %s124_s30, 256, %s272_s3, [#allocation4], %s196_s22, %s196_s22, %s197_s23  }
 0x1ec   :  { %193 = dma.done.wait [#allocation4], 256  }
 0x1ed   :  { %194 = vsyncadd [#allocation4], 4294967040 }
 0x1ee   :  { %133 = vsyncpa [#allocation3], 1 }
 0x1ef   :  { %134 = vsyncpa [#allocation4], 1 }

</bundles_post_ra>
